<compile_context>
chip_gen: v7x
topology: tpu7x:2x2x1
jax: 0.10.0
libtpu: 0.0.40
codegen_flags: <defaults>
</compile_context>

<pallas_src>
import functools

import numpy as np
import jax
import jax.numpy as jnp
from jax import lax
from jax.scipy import special as jsp
from jax.experimental import pallas as pl
from jax.experimental.pallas import tpu as pltpu

KE = 14.3996
PI = float(np.pi)
SQRT_PI = float(np.sqrt(np.pi))

# Abramowitz & Stegun 7.1.26:  erfc(x) = P(x) * exp(-x*x)  for x >= 0,
# |abs err| <= 1.5e-7.  The kernels use the *scaled* polynomial P directly so
# the exp factors can be combined with the Ewald prefactors (no overflow).
_EP = 0.3275911
_EA1, _EA2, _EA3, _EA4, _EA5 = (0.254829592, -0.284496736, 1.421413741,
                                -1.453152027, 1.061405429)


def _erfc_poly(ax):
    """P(|x|) such that erfc(|x|) = P(|x|) * exp(-x*x)."""
    t = 1.0 / (1.0 + _EP * ax)
    return t * (_EA1 + t * (_EA2 + t * (_EA3 + t * (_EA4 + t * _EA5))))


# ---------------------------------------------------------------------------
# Pallas kernel 1: 2D-Ewald Coulomb energy (per pair-tile partial sums)
# ---------------------------------------------------------------------------
def _coulomb_kernel(params_ref, proj_ref, d_ref, out_ref, *,
                    n_k_pad, n_img, n_img_pad):
    alpha = params_ref[0]
    scale_recip = params_ref[1]       # ke*pi/(2*area)
    scale_corr = params_ref[2]        # ke*pi/area
    scale_real = params_ref[3]        # 0.5*ke
    inv_a_sqrt_pi = params_ref[4]     # 1/(alpha*sqrt(pi))

    dmat = d_ref[...]                 # (8, P): dx, dy, dz, 1, qq, self, 0, 0
    proj = proj_ref[...]              # (5*n_k_pad + n_img_pad, 8)

    # One MXU matmul projects every per-(k,pair)/per-(image,pair) linear form.
    t = jnp.dot(proj, dmat, preferred_element_type=jnp.float32)

    hd = t[0 * n_k_pad:1 * n_k_pad]                 # h . d
    u = t[1 * n_k_pad:2 * n_k_pad]                  # |h| * dz
    x1 = t[2 * n_k_pad:3 * n_k_pad]                 # |h|/(2a) + a*dz
    x2 = t[3 * n_k_pad:4 * n_k_pad]                 # |h|/(2a) - a*dz
    inv_dh = t[4 * n_k_pad:5 * n_k_pad]             # 1/|h| (0 on padded k rows)
    cross = t[5 * n_k_pad:5 * n_k_pad + n_img_pad]  # 2 a.d + |a|^2

    dx = dmat[0:1, :]
    dy = dmat[1:2, :]
    dz = dmat[2:3, :]
    qq = dmat[4:5, :]
    self_m = dmat[5:6, :]

    # ---- reciprocal-space sum over k != 0 (scaled-erfcx form) -----------------
    # exp(+u)*erfc(x1) + exp(-u)*erfc(x2)   with   u - x1^2 = -u - x2^2 = g <= 0
    g = u - x1 * x1
    exp_g = jnp.exp(g)
    exp_u = jnp.exp(jnp.clip(u, -60.0, 60.0))       # only its u<0 branch is selected
    exp_nu = pl.reciprocal(exp_u, approx=True)      # exp(-u); only used where tiny
    p1 = _erfc_poly(jnp.abs(x1))
    p2 = _erfc_poly(jnp.abs(x2))
    e1 = jnp.where(x1 >= 0.0, exp_g * p1, 2.0 * exp_u - exp_g * p1)
    e2 = jnp.where(x2 >= 0.0, exp_g * p2, 2.0 * exp_nu - exp_g * p2)
    sum_recip = jnp.sum(qq * jnp.cos(hd) * (e1 + e2) * inv_dh)

    # ---- k = 0 (z) correction term ---------------------------------------------
    w = alpha * dz
    ew = jnp.exp(-w * w)
    erf_w = jnp.where(w >= 0.0, 1.0, -1.0) * (1.0 - _erfc_poly(jnp.abs(w)) * ew)
    sum_corr = jnp.sum(qq * (dz * erf_w + ew * inv_a_sqrt_pi))

    # ---- real-space sum over lattice images -------------------------------------
    dsq = (dx * dx + dy * dy + dz * dz) + cross     # (n_img_pad, P)
    row = lax.broadcasted_iota(jnp.int32, dsq.shape, 0)
    skip = jnp.logical_or(
        jnp.logical_and(row == 0, self_m > 0.5),    # self pair at the (0,0) image
        row >= n_img)                               # padded image rows
    safe = jnp.where(skip, 1.0, dsq)
    inv_d = lax.rsqrt(safe)
    a_d = (alpha * safe) * inv_d                    # alpha * |d + a|
    erfc_ad = _erfc_poly(a_d) * jnp.exp(-(alpha * alpha) * safe)
    sum_real = jnp.sum(jnp.where(skip, 0.0, qq * erfc_ad * inv_d))

    partial = (scale_recip * sum_recip - scale_corr * sum_corr
               + scale_real * sum_real)
    out_ref[...] = partial * jnp.ones(out_ref.shape, jnp.float32)


def _build_ewald_tables(cell0, recip0, alpha, k_max, r_max):
    """Host-side tables: kernel projection matrix + small tables for the
    pure-JAX (differentiable) force path."""
    alpha = float(alpha)
    kcell = 2.0 * np.pi * np.asarray(recip0, np.float64)
    hs, dhs = [], []
    for b0 in range(-k_max, k_max + 1):
        for b1 in range(-k_max, k_max + 1):
            if b0 == 0 and b1 == 0:
                continue
            h = b0 * kcell[0] + b1 * kcell[1]
            hs.append(h)
            dhs.append(float(np.linalg.norm(h)))
    n_k = len(dhs)
    n_k_pad = max(8, ((n_k + 7) // 8) * 8)

    h_hd = np.zeros((n_k_pad, 8), np.float64)
    h_u = np.zeros((n_k_pad, 8), np.float64)
    h_x1 = np.zeros((n_k_pad, 8), np.float64)
    h_x2 = np.zeros((n_k_pad, 8), np.float64)
    h_inv = np.zeros((n_k_pad, 8), np.float64)
    for i, (h, dh) in enumerate(zip(hs, dhs)):
        h_hd[i, 0:3] = h
        h_u[i, 2] = dh
        h_x1[i, 2] = alpha
        h_x1[i, 3] = dh / (2.0 * alpha)
        h_x2[i, 2] = -alpha
        h_x2[i, 3] = dh / (2.0 * alpha)
        h_inv[i, 3] = 1.0 / dh

    cell64 = np.asarray(cell0, np.float64)
    imgs = [(0, 0)] + [(n0, n1) for n0 in range(-r_max, r_max + 1)
                       for n1 in range(-r_max, r_max + 1)
                       if not (n0 == 0 and n1 == 0)]
    n_img = len(imgs)
    n_img_pad = max(8, ((n_img + 7) // 8) * 8)
    a_proj = np.zeros((n_img_pad, 8), np.float64)
    atab = np.zeros((n_img, 4), np.float64)
    for i, (n0, n1) in enumerate(imgs):
        a = n0 * cell64[0] + n1 * cell64[1]
        a_proj[i, 0:3] = 2.0 * a
        a_proj[i, 3] = float(np.dot(a, a))
        atab[i, 0:3] = a
        atab[i, 3] = 1.0 if (n0 == 0 and n1 == 0) else 0.0

    proj = np.concatenate([h_hd, h_u, h_x1, h_x2, h_inv, a_proj],
                          axis=0).astype(np.float32)
    htab = np.concatenate([np.asarray(hs, np.float64),
                           np.asarray(dhs, np.float64)[:, None]],
                          axis=1).astype(np.float32)
    return dict(proj=proj, n_k_pad=n_k_pad, n_img=n_img, n_img_pad=n_img_pad,
                htab=htab, atab=atab.astype(np.float32))


def _coulomb_pallas(r_shift, q, tables, alpha, ke, area):
    n = int(r_shift.shape[0])
    p = n * n
    proj = tables['proj']
    n_k_pad = tables['n_k_pad']
    n_img = tables['n_img']
    n_img_pad = tables['n_img_pad']

    # lane-dense pair layout; tile width bounded so the (n_proj, p_tile)
    # projected block stays ~2 MiB (well inside scoped VMEM on v5e/v6e/v7x).
    p_pad = max(128, ((p + 127) // 128) * 128)
    row_bytes = 4 * (proj.shape[0] + 16)
    p_tile = int(max(128, min(512, ((2 << 20) // row_bytes) // 128 * 128)))
    p_tile = min(p_tile, p_pad)
    p_pad = ((p_pad + p_tile - 1) // p_tile) * p_tile
    num_tiles = p_pad // p_tile
    pad = p_pad - p

    diff = (r_shift[:, None, :] - r_shift[None, :, :]).reshape(p, 3)
    qq = (q[:, None] * q[None, :]).reshape(p)
    self_m = jnp.eye(n, dtype=jnp.float32).reshape(p)
    dmat = jnp.stack([
        jnp.pad(diff[:, 0], (0, pad)),
        jnp.pad(diff[:, 1], (0, pad)),
        jnp.pad(diff[:, 2], (0, pad)),
        jnp.ones((p_pad,), jnp.float32),
        jnp.pad(qq, (0, pad)),                                   # padded qq = 0
        jnp.pad(self_m, (0, pad), constant_values=1.0),          # padded = "self"
        jnp.zeros((p_pad,), jnp.float32),
        jnp.zeros((p_pad,), jnp.float32),
    ], axis=0).astype(jnp.float32)

    params = jnp.asarray([alpha,
                          ke * PI / (2.0 * area),
                          ke * PI / area,
                          0.5 * ke,
                          1.0 / (alpha * SQRT_PI),
                          0.0, 0.0, 0.0], jnp.float32)

    kern = functools.partial(_coulomb_kernel, n_k_pad=n_k_pad,
                             n_img=n_img, n_img_pad=n_img_pad)
    partials = pl.pallas_call(
        kern,
        out_shape=jax.ShapeDtypeStruct((num_tiles, 8, 128), jnp.float32),
        grid=(num_tiles,),
        in_specs=[
            pl.BlockSpec(memory_space=pltpu.MemorySpace.SMEM),      # params
            pl.BlockSpec((proj.shape[0], 8), lambda t: (0, 0)),     # projection table
            pl.BlockSpec((8, p_tile), lambda t: (0, t)),            # pair planes
        ],
        out_specs=pl.BlockSpec((1, 8, 128), lambda t: (t, 0, 0)),
        compiler_params=pltpu.CompilerParams(
            dimension_semantics=("parallel",)),
    )(params, jnp.asarray(proj), dmat)

    # self energy: cheap host/XLA scalar (moved out of the kernel)
    self_energy = (-alpha / SQRT_PI) * ke * jnp.sum(q * q)
    return jnp.sum(partials[:, 0, 0]) + self_energy


# ---------------------------------------------------------------------------
# Pallas kernel 2: Born repulsion per-pair energies (lane-dense 2-D layout)
# ---------------------------------------------------------------------------
def _born_kernel(x_ref, out_ref):
    d = x_ref[0]
    n = x_ref[1]
    b = x_ref[2]
    b_cut = x_ref[3]           # b * cutoff**(-n), precomputed on host
    m = x_ref[4]
    e = b * jnp.exp(-n * jnp.log(d)) - b_cut        # b*d**(-n) - b*cutoff**(-n)
    out_ref[...] = jnp.where(m > 0.5, e, 0.0)


def _born_pairs_pallas(d_ij, n_ij, b_ij, b_cut_ij, mask):
    # TODO(synk): for very small pair counts this launch could be fused into the
    # Coulomb pallas_call (or left to plain XLA); kept separate for clarity.
    p = int(d_ij.shape[0])
    lanes = 128
    rows = max(8, ((-(-p // lanes) + 7) // 8) * 8)
    tile_r = rows if rows <= 128 else 128
    rows = ((rows + tile_r - 1) // tile_r) * tile_r
    p_pad = rows * lanes
    pad = p_pad - p

    stacked = jnp.stack([
        jnp.pad(jnp.asarray(d_ij, jnp.float32), (0, pad), constant_values=1.0),
        jnp.pad(jnp.asarray(n_ij, jnp.float32), (0, pad), constant_values=1.0),
        jnp.pad(jnp.asarray(b_ij, jnp.float32), (0, pad)),
        jnp.pad(jnp.asarray(b_cut_ij, jnp.float32), (0, pad)),
        jnp.pad(jnp.asarray(mask, jnp.float32), (0, pad)),
    ], axis=0).reshape(5, rows, lanes)

    out = pl.pallas_call(
        _born_kernel,
        out_shape=jax.ShapeDtypeStruct((rows, lanes), jnp.float32),
        grid=(rows // tile_r,),
        in_specs=[pl.BlockSpec((5, tile_r, lanes), lambda r: (0, r, 0))],
        out_specs=pl.BlockSpec((tile_r, lanes), lambda r: (r, 0)),
        compiler_params=pltpu.CompilerParams(
            dimension_semantics=("parallel",)),
    )(stacked)
    return out.reshape(p_pad)[:p]


# ---------------------------------------------------------------------------
# Pure-JAX (differentiable) Coulomb energy -- used only for the force terms.
# ---------------------------------------------------------------------------
def _coulomb_energy_jax(rs, q, htab, atab, alpha, ke, area):
    diff = rs[:, None, :] - rs[None, :, :]
    dz = diff[..., 2]
    qq = q[:, None] * q[None, :]
    hvec = htab[:, :3]
    dh = htab[:, 3][:, None, None]
    hd = jnp.einsum('kc,ijc->kij', hvec, diff)
    e1 = jnp.exp(dh * dz) * jsp.erfc(dh / (2.0 * alpha) + alpha * dz)
    e2 = jnp.exp(-dh * dz) * jsp.erfc(dh / (2.0 * alpha) - alpha * dz)
    sum_recip = jnp.sum(qq[None] * jnp.cos(hd) * (e1 + e2) / dh)
    corr = qq * (dz * jsp.erf(alpha * dz)
                 + jnp.exp(-(alpha * dz) ** 2) / (alpha * SQRT_PI))
    sum_corr = jnp.sum(corr)
    avec = atab[:, :3]
    zero_img = atab[:, 3][:, None, None]
    r = diff[None] + avec[:, None, None, :]
    dsq = jnp.sum(r * r, axis=-1)
    skip = jnp.logical_and(dsq == 0.0, zero_img > 0.5)
    d = jnp.sqrt(jnp.where(skip, 1.0, dsq))                  # double-where, grad safe
    sum_real = jnp.sum(jnp.where(skip, 0.0, qq[None] * jsp.erfc(alpha * d) / d))
    sum_q2 = jnp.sum(q * q)
    recip_energy = ke * PI * sum_recip / (2.0 * area) - ke * PI * sum_corr / area
    real_energy = sum_real * ke * 0.5
    self_energy = -alpha / SQRT_PI * sum_q2 * ke
    return recip_energy + real_energy + self_energy


# ---------------------------------------------------------------------------
# forward (mirrors IonicPotential2D.forward)
# ---------------------------------------------------------------------------
def ionic_potential_2d_forward(inputs, r0_dict, ns_dict, *,
                               alpha, k_max, r_max, cutoff, z_shift=False):
    z_str = '_z' if z_shift else ''
    ke = KE

    q = jnp.asarray(inputs['partial_charges'], jnp.float32).squeeze(-1)
    idx_m = jnp.asarray(inputs['idx_m'], jnp.int32)
    cell = np.asarray(inputs['cell'], np.float32)
    recip_cell = np.asarray(inputs['recip_cell'], np.float32)
    area = float(np.linalg.norm(np.cross(cell[0][0], cell[0][1])))
    z_num = np.asarray(inputs['Z']).astype(int)
    idx_i = jnp.asarray(inputs['idx_i'], jnp.int32)
    idx_j = jnp.asarray(inputs['idx_j'], jnp.int32)
    is_film = np.asarray(inputs['is_film']).astype(int)
    film_mask = jnp.asarray(is_film, jnp.float32)          # 1 = film, 0 = substrate
    R = jnp.asarray(inputs[f'R{z_str}'], jnp.float32)
    shift = jnp.asarray(inputs['shift'], jnp.float32)
    offsets = jnp.asarray(inputs['offsets'], jnp.float32)
    n_atoms_per_mol = np.asarray(inputs['n_atoms']).astype(int)
    n_atoms = int(q.shape[0])
    n_mol = int(np.asarray(inputs['idx_m'])[-1]) + 1

    # host-side dict lookups (glue): r0 / n tables for every candidate pair
    idx_i_np = np.asarray(inputs['idx_i']).astype(int)
    idx_j_np = np.asarray(inputs['idx_j']).astype(int)
    keys = [(int(is_film[i]), int(is_film[j]), int(z_num[i]), int(z_num[j]))
            for i, j in zip(idx_i_np, idx_j_np)]
    r0_ij = jnp.asarray([r0_dict[k] for k in keys], jnp.float32)
    n_ij = jnp.asarray([ns_dict[k[2:]] for k in keys], jnp.float32)

    def make_r_shift(shift_):
        shifts = jnp.repeat(shift_, repeats=n_atoms_per_mol, axis=0,
                            total_repeat_length=n_atoms)
        shifts = shifts * film_mask[:, None]     # substrate atoms are not shifted
        return R + shifts

    r_shift = make_r_shift(shift)

    # ---- Born repulsion (Pallas hot path) -------------------------------------
    r_ij = r_shift[idx_j] - r_shift[idx_i] + offsets
    d_ij = jnp.sqrt(jnp.sum(r_ij * r_ij, axis=1))
    in_cut = (d_ij < cutoff).astype(jnp.float32)   # masked instead of index-filtered
    q_ij = jnp.abs(q[idx_i] * q[idx_j])
    b_ij = q_ij * r0_ij ** (n_ij - 1.0) / n_ij
    b_cut_ij = b_ij * cutoff ** (-n_ij)            # host: halves in-kernel EUP work
    pair_e = _born_pairs_pallas(d_ij, n_ij, b_ij, b_cut_ij, in_cut)
    y_born_atoms = jax.ops.segment_sum(pair_e, idx_i, num_segments=n_atoms)
    y_born_mol = jax.ops.segment_sum(y_born_atoms, idx_m, num_segments=n_mol)
    y_born_scaled = 0.5 * ke * y_born_mol
    y_born = (jnp.squeeze(y_born_scaled, -1)
              if y_born_scaled.shape[-1] == 1 else y_born_scaled)

    # ---- Coulomb energy (Pallas hot path) --------------------------------------
    tables = _build_ewald_tables(cell[0], recip_cell[0], alpha, k_max, r_max)
    y_coulomb = _coulomb_pallas(r_shift, q, tables, alpha, ke, area).reshape(1)

    y_energy = y_coulomb + y_born

    # ---- force terms (1st / 2nd order autodiff) --------------------------------
    # TODO(synk): autodiff *through* the Pallas kernels would require
    # jax.custom_vjp (with a differentiable bwd for the 2nd-order term); the
    # gradients below use a mathematically identical pure-JAX energy instead.
    htab_j = jnp.asarray(tables['htab'])
    atab_j = jnp.asarray(tables['atab'])

    def energy_from_rs(rs):
        rij_ = rs[idx_j] - rs[idx_i] + offsets
        d_ = jnp.sqrt(jnp.sum(rij_ * rij_, axis=1))
        e_ = b_ij * (1.0 / d_ ** n_ij - 1.0 / cutoff ** n_ij)
        e_ = jnp.where(d_ < cutoff, e_, 0.0)
        yb_a = jax.ops.segment_sum(e_, idx_i, num_segments=n_atoms)
        yb_m = jax.ops.segment_sum(yb_a, idx_m, num_segments=n_mol)
        yb = 0.5 * ke * yb_m
        yc = _coulomb_energy_jax(rs, q, htab_j, atab_j, alpha, ke, area)
        return jnp.sum(yc + yb)

    def film_force_norm_fn(shift_):
        rs = make_r_shift(shift_)
        dedr = -jax.grad(energy_from_rs)(rs)
        dedr = dedr * film_mask[:, None]            # zero substrate rows
        film_force = jax.ops.segment_sum(dedr, idx_m, num_segments=n_mol)
        return jnp.squeeze(jnp.sum(film_force * film_force, axis=1))

    film_force_norm = film_force_norm_fn(shift)
    film_norm_grad = jnp.squeeze(jax.grad(film_force_norm_fn)(shift))

    return y_energy, y_coulomb, y_born, film_force_norm, film_norm_grad


# ---------------------------------------------------------------------------
if __name__ == "__main__":
    key = jax.random.PRNGKey(0)
    N = 8
    alpha = 0.3
    k_max = 2
    r_max = 1
    cutoff = 4.0

    cell0 = np.diag([5.0, 5.0, 20.0]).astype(np.float32)
    recip0 = np.linalg.inv(cell0).T.astype(np.float32)

    k1, k2, k3 = jax.random.split(key, 3)
    R = jax.random.uniform(k1, (N, 3), jnp.float32, 0.5, 4.5)
    R = R.at[:, 2].set(jax.random.uniform(k2, (N,), jnp.float32, 0.5, 3.5))
    q = jax.random.uniform(k3, (N,), jnp.float32, -1.0, 1.0)

    Z = np.array([1, 2, 1, 2, 1, 2, 1, 2], np.int32)
    is_film = np.array([0, 0, 0, 0, 1, 1, 1, 1], np.int32)
    pairs = np.array([(i, j) for i in range(N) for j in range(N) if i != j],
                     np.int32)
    idx_i_np = pairs[:, 0]
    idx_j_np = pairs[:, 1]

    inputs = {
        'partial_charges': np.asarray(q).reshape(N, 1),
        'idx_m': np.zeros((N,), np.int32),
        'cell': cell0[None, :, :],
        'recip_cell': recip0[None, :, :],
        'Z': Z,
        'idx_i': idx_i_np,
        'idx_j': idx_j_np,
        'is_film': is_film,
        'R': np.asarray(R),
        'shift': np.array([[0.1, -0.2, 0.3]], np.float32),
        'n_atoms': np.array([N], np.int32),
        'offsets': np.zeros((len(idx_i_np), 3), np.float32),
    }

    # deterministic synthetic r0 / n dictionaries covering every pair key
    r0_dict = {}
    for fi in (0, 1):
        for fj in (0, 1):
            for zi in (1, 2):
                for zj in (1, 2):
                    r0_dict[(fi, fj, zi, zj)] = 1.5 + 0.1 * fi + 0.2 * fj \
                                                + 0.05 * zi + 0.07 * zj
    ns_dict = {(zi, zj): 6.0 + 0.5 * (zi + zj) for zi in (1, 2) for zj in (1, 2)}

    outs = ionic_potential_2d_forward(inputs, r0_dict, ns_dict,
                                      alpha=alpha, k_max=k_max, r_max=r_max,
                                      cutoff=cutoff)
    for o in outs:
        jax.block_until_ready(o)
    print("KERNEL_OK")
</pallas_src>

<mosaic_0001>
module attributes {stable_mosaic.version = 11 : i64} {
  func.func @_born_kernel(%arg0: i32, %arg1: memref<5x8x128xf32, #tpu.memory_space<vmem>>, %arg2: memref<8x128xf32, #tpu.memory_space<vmem>>) attributes {dimension_semantics = [#tpu.dimension_semantics<parallel>], iteration_bounds = array<i64: 1>, scalar_prefetch = 0 : i64, scratch_operands = 0 : i64, tpu.core_type = #tpu.core_type<tc>, window_params = [{transform_indices = @transform_0, window_bounds = array<i64: 5, 8, 128>}, {transform_indices = @transform_1, window_bounds = array<i64: 8, 128>}]} {
    %c0 = arith.constant 0 : index
    %c0_0 = arith.constant 0 : index
    %c0_1 = arith.constant 0 : index
    %0 = vector.load %arg1[%c0, %c0_0, %c0_1] : memref<5x8x128xf32, #tpu.memory_space<vmem>>, vector<1x8x128xf32>
    %1 = vector.shape_cast %0 : vector<1x8x128xf32> to vector<8x128xf32>
    %c1 = arith.constant 1 : index
    %c0_2 = arith.constant 0 : index
    %c0_3 = arith.constant 0 : index
    %2 = vector.load %arg1[%c1, %c0_2, %c0_3] : memref<5x8x128xf32, #tpu.memory_space<vmem>>, vector<1x8x128xf32>
    %3 = vector.shape_cast %2 : vector<1x8x128xf32> to vector<8x128xf32>
    %c2 = arith.constant 2 : index
    %c0_4 = arith.constant 0 : index
    %c0_5 = arith.constant 0 : index
    %4 = vector.load %arg1[%c2, %c0_4, %c0_5] : memref<5x8x128xf32, #tpu.memory_space<vmem>>, vector<1x8x128xf32>
    %5 = vector.shape_cast %4 : vector<1x8x128xf32> to vector<8x128xf32>
    %c3 = arith.constant 3 : index
    %c0_6 = arith.constant 0 : index
    %c0_7 = arith.constant 0 : index
    %6 = vector.load %arg1[%c3, %c0_6, %c0_7] : memref<5x8x128xf32, #tpu.memory_space<vmem>>, vector<1x8x128xf32>
    %7 = vector.shape_cast %6 : vector<1x8x128xf32> to vector<8x128xf32>
    %c4 = arith.constant 4 : index
    %c0_8 = arith.constant 0 : index
    %c0_9 = arith.constant 0 : index
    %8 = vector.load %arg1[%c4, %c0_8, %c0_9] : memref<5x8x128xf32, #tpu.memory_space<vmem>>, vector<1x8x128xf32>
    %9 = vector.shape_cast %8 : vector<1x8x128xf32> to vector<8x128xf32>
    %cst = arith.constant 0.000000e+00 : f32
    %10 = vector.broadcast %cst : f32 to vector<8x128xf32>
    %11 = arith.subf %10, %3 : vector<8x128xf32>
    %12 = math.log %1 : vector<8x128xf32>
    %13 = arith.mulf %11, %12 : vector<8x128xf32>
    %14 = math.exp %13 : vector<8x128xf32>
    %15 = arith.mulf %5, %14 : vector<8x128xf32>
    %16 = arith.subf %15, %7 : vector<8x128xf32>
    %cst_10 = arith.constant 5.000000e-01 : f32
    %17 = vector.broadcast %cst_10 : f32 to vector<8x128xf32>
    %18 = arith.cmpf ogt, %9, %17 : vector<8x128xf32>
    %cst_11 = arith.constant 0.000000e+00 : f32
    %19 = vector.broadcast %cst_11 : f32 to vector<8x128xf32>
    %20 = arith.select %18, %16, %19 : vector<8x128xi1>, vector<8x128xf32>
    %c0_12 = arith.constant 0 : index
    %c0_13 = arith.constant 0 : index
    %21 = vector.load %arg2[%c0_12, %c0_13] : memref<8x128xf32, #tpu.memory_space<vmem>>, vector<8x128xf32>
    tpu.vector_store %arg2[%c0_12, %c0_13], %20 {strides = array<i32>} : memref<8x128xf32, #tpu.memory_space<vmem>>, vector<8x128xf32>,
    return
  }
  func.func @transform_0(%arg0: i32) -> (i32, i32, i32) {
    %c0_i32 = arith.constant 0 : i32
    %c0_i32_0 = arith.constant 0 : i32
    %c0_i32_1 = arith.constant 0 : i32
    return %c0_i32, %arg0, %c0_i32_0 : i32, i32, i32
  }
  func.func @transform_1(%arg0: i32) -> (i32, i32) {
    %c0_i32 = arith.constant 0 : i32
    %c0_i32_0 = arith.constant 0 : i32
    return %arg0, %c0_i32 : i32, i32
  }
}

</mosaic_0001>

<bundles_post_ra>
// kernel: tpu_custom_call.1
= control target key start
LH: loop header
LB: loop body
LE: loop exit
PB: predicated region body
PF: predicated region fallthrough
CT: control target
= control target key end

     0   :  { %6 = vsyncpa [#allocation3], 0  ;;  %s152_s0 = inlined_call_operand.hbm [shape: f32[5,8,128], index: 0, kind: input, shape index: {}]   ;;  %s153_s1 = inlined_call_operand.hbm [shape: f32[8,128], index: 1, kind: output, shape index: {}]  }
   0x1   :  { %7 = vsyncpa [#allocation4], 0  ;;  %s114_s6 = smov [#allocation2]   ;;  %s66_s10 = scalar_lea.hbm %s152_s0, 640 }
   0x2   :  { %s13_s7 = sshll.u32 %s114_s6, 4  ;;  %p67_p0 = scmp.ne.s32.totalorder %s152_s0, %s66_s10  ;;  %s14_s7 = int_to_ptr.vmem [resolvable:$true] %s13_s7 }
   0x3   :  { %p70_p1 = scmp.lt.u32.totalorder %s66_s10, %s152_s0 }
   0x5   :  { %p72_p2 = pnand %p70_p1, %p67_p0 }
   0x7   :  { %75 = shalt.err (!%p72_p2)
}
   0x8   :  { %s76_s15 = scalar_lea.vmem %s14_s7, 640  ;;  %p81_p4 = scmp.lt.s32.totalorder %s14_s7, %s14_s7 }
   0x9   :  { %p77_p3 = scmp.ne.s32.totalorder %s14_s7, %s76_s15  ;;  %p82_p5 = scmp.lt.s32.totalorder %s76_s15, %s76_s15 }
   0xb   :  { %p83_p6 = por %p82_p5, %p81_p4 }
   0xd   :  { %p84_p7 = pnand %p83_p6, %p77_p3 }
   0xf   :  { %87 = shalt.err (!%p84_p7)
}
  0x10   :  { %s115_s16 = smov 128   ;;  %s116_s17 = smov 8  }
  0x11   :  { %19 = dma.hbm_to_vmem [thread:$0]  %s152_s0, 640, %s14_s7, [#allocation3], %s115_s16, %s115_s16, %s116_s17  }
  0x12   :  { %110 = dma.done.wait [#allocation3], 640  }
  0x13   :  { %111 = vsyncadd [#allocation3], 4294966656  ;;  %v23_v0 = vld [vmem:[#allocation2] sm:$0xff]  ;;  %v25_v1 = vld [vmem:[#allocation2 + $0x8] sm:$0xff]  ;;  %s117_s20 = smov [#allocation5]  }
  0x14   :  { %62 = vlog2.f32 %v23_v0  ;;  %v32_v2 = vsub.f32 0.0, %v25_v1  ;;  %v27_v7 = vld [vmem:[#allocation2 + $0x10] sm:$0xff]  ;;  %v31_v8 = vld [vmem:[#allocation2 + $0x20] sm:$0xff]  ;;  %v29_v10 = vld [vmem:[#allocation2 + $0x18] sm:$0xff]  ;;  %s49_s21 = sshll.u32 %s117_s20, 4  ;;  %s50_s21 = int_to_ptr.vmem [resolvable:$true] %s49_s21 }
  0x15   :  { %vm40_vm0 = vcmp.gt.f32.partialorder %v31_v8, 0.5  ;;  %s88_s0 = scalar_lea.vmem %s50_s21, 128  ;;  %p93_p9 = scmp.lt.s32.totalorder %s50_s21, %s50_s21 }
  0x16   :  { %p89_p8 = scmp.ne.s32.totalorder %s50_s21, %s88_s0  ;;  %p94_p10 = scmp.lt.s32.totalorder %s88_s0, %s88_s0 }
  0x18   :  { %p95_p11 = por %p94_p10, %p93_p9 }
  0x1a   :  { %p96_p12 = pnand %p95_p11, %p89_p8 }
  0x1e   :  { %v63_v3 = vpop.eup %62 }
  0x1f   :  { %v34_v4 = vmul.f32 0.6931472, %v63_v3 }
  0x21   :  { %v35_v5 = vmul.f32 %v34_v4, %v32_v2 }
  0x23   :  { %v36_v6 = vmul.f32 1.442695, %v35_v5 }
  0x25   :  { %64 = vpow2.f32 %v36_v6 }
  0x2f   :  { %v65_v9 = vpop.eup %64 }
  0x30   :  { %v38_v11 = vmul.f32 %v65_v9, %v27_v7 }
  0x32   :  { %v39_v12 = vsub.f32 %v38_v11, %v29_v10 }
  0x34   :  { %v41_v13 = vsel %vm40_vm0, %v39_v12, 0.0 }
  0x35   :  { %42 = vst [vmem:[#allocation5] sm:$0xff] %v41_v13 }
  0x36   :  { %99 = shalt.err (!%p96_p12)
}
  0x37   :  { %s100_s24 = scalar_lea.hbm %s153_s1, 128 }
  0x38   :  { %p101_p13 = scmp.ne.s32.totalorder %s153_s1, %s100_s24  ;;  %p104_p0 = scmp.lt.u32.totalorder %s100_s24, %s153_s1 }
  0x3a   :  { %p106_p1 = pnand %p104_p0, %p101_p13 }
  0x3c   :  { %109 = shalt.err (!%p106_p1)
}
  0x3d   :  { %52 = dma.vmem_to_hbm [thread:$0]  %s50_s21, 128, %s153_s1, [#allocation4]  }
  0x3e   :  { %112 = dma.done.wait [#allocation4], 128  }
  0x3f   :  { %113 = vsyncadd [#allocation4], 4294967168 }
  0x40   :  { %56 = vsyncpa [#allocation3], 1 }
  0x41   :  { %57 = vsyncpa [#allocation4], 1 }

</bundles_post_ra>
